<compile_context>
chip_gen: v6e
topology: v6e:2x2x1
jax: 0.10.0
libtpu: 0.0.40
codegen_flags: <defaults>
</compile_context>

<pallas_src>
import jax
import jax.numpy as jnp
from jax.experimental import pallas as pl
from jax.experimental.pallas import tpu as pltpu


def _pick_block(dim: int, quantum: int, target: int) -> int:
    """Largest multiple of `quantum` that divides `dim` and is <= `target`.

    Falls back to the full dim when `dim` is not a multiple of `quantum`
    (full-extent block dims bypass the (8, 128) divisibility rule).
    """
    if dim % quantum != 0:
        return dim
    t = min(target, dim)
    t -= t % quantum
    for cand in range(t, 0, -quantum):
        if dim % cand == 0:
            return cand
    return dim


def _scaled_tanh_kernel(w_ref, x_ref, o_ref):
    # w_ref: (TR, 1) per-row weight column (f32, VMEM)
    # x_ref / o_ref: (TR, TL) lane-dense activation tile
    x = x_ref[...].astype(jnp.float32)
    w = w_ref[...]                               # (TR, 1) broadcasts over lanes
    o_ref[...] = (w * jnp.tanh(x)).astype(o_ref.dtype)


def scaled_tanh(x: jax.Array, weight: jax.Array) -> jax.Array:
    """Apply out = weight * tanh(x) with per-channel weight.

    x:      (N, C, H, W)
    weight: (C, 1, 1)  (PyTorch nn.Parameter shape), broadcast over N, H, W.
    """
    N, C, H, W = x.shape
    R, L = N * C, H * W

    # Free reshape for contiguous NCHW: rows indexed by (n, c), lanes by (h, w).
    x2 = x.reshape(R, L)
    # Tiny (R, 1) per-row weight table (one scalar per (n, c) row). The actual
    # w * tanh(x) multiply stays fused inside the kernel.
    w_rows = jnp.broadcast_to(
        weight.reshape(1, C).astype(jnp.float32), (N, C)
    ).reshape(R, 1)

    # ~2 MiB f32 input blocks max (256 rows x 2048 lanes); sized to fit the
    # double-buffered input+output comfortably on all TPU generations.
    tr = _pick_block(R, 8, 256)
    tl = _pick_block(L, 128, 2048)
    grid = (R // tr, L // tl)

    out2 = pl.pallas_call(
        _scaled_tanh_kernel,
        out_shape=jax.ShapeDtypeStruct((R, L), x.dtype),
        grid_spec=pltpu.PrefetchScalarGridSpec(
            num_scalar_prefetch=0,
            grid=grid,
            in_specs=[
                pl.BlockSpec((tr, 1), lambda i, j: (i, 0)),     # weight column
                pl.BlockSpec((tr, tl), lambda i, j: (i, j)),    # x tile
            ],
            out_specs=pl.BlockSpec((tr, tl), lambda i, j: (i, j)),
        ),
        compiler_params=pltpu.CompilerParams(
            dimension_semantics=("parallel", "parallel"),
            vmem_limit_bytes=32 * 1024 * 1024,
        ),
    )(w_rows, x2)

    return out2.reshape(N, C, H, W)


if __name__ == "__main__":
    key = jax.random.PRNGKey(0)
    kx, kw = jax.random.split(key)

    N, C, H, W = 2, 4, 16, 16
    x = jax.random.normal(kx, (N, C, H, W), dtype=jnp.float32)

    # nn.Parameter(torch.zeros(weight_size)) with weight_size=(C,1,1).
    # __init__ uses zeros; use a deterministic non-zero value so the kernel's
    # broadcasting/compute is actually exercised.
    weight = jax.random.normal(kw, (C, 1, 1), dtype=jnp.float32)

    out = scaled_tanh(x, weight)
    out = jax.block_until_ready(out)

    # Pure-JAX reference of the PyTorch forward semantics.
    ref = weight[None, :, :, :] * jnp.tanh(x)
    assert out.shape == x.shape
    assert jnp.allclose(out, ref, atol=1e-6, rtol=1e-6)

    print("KERNEL_OK")
</pallas_src>

<mosaic_0001>
module attributes {stable_mosaic.version = 11 : i64} {
  func.func @_scaled_tanh_kernel(%arg0: i32, %arg1: i32, %arg2: memref<8x1xf32, #tpu.memory_space<vmem>>, %arg3: memref<8x256xf32, #tpu.memory_space<vmem>>, %arg4: memref<8x256xf32, #tpu.memory_space<vmem>>) attributes {dimension_semantics = [#tpu.dimension_semantics<parallel>, #tpu.dimension_semantics<parallel>], iteration_bounds = array<i64: 1, 1>, scalar_prefetch = 0 : i64, scratch_operands = 0 : i64, tpu.core_type = #tpu.core_type<tc>, window_params = [{transform_indices = @transform_0, window_bounds = array<i64: 8, 1>}, {transform_indices = @transform_1, window_bounds = array<i64: 8, 256>}, {transform_indices = @transform_2, window_bounds = array<i64: 8, 256>}]} {
    %c0 = arith.constant 0 : index
    %c0_0 = arith.constant 0 : index
    %0 = vector.load %arg3[%c0, %c0_0] : memref<8x256xf32, #tpu.memory_space<vmem>>, vector<8x256xf32>
    %c0_1 = arith.constant 0 : index
    %c0_2 = arith.constant 0 : index
    %1 = vector.load %arg2[%c0_1, %c0_2] : memref<8x1xf32, #tpu.memory_space<vmem>>, vector<8x1xf32>
    %2 = math.tanh %0 : vector<8x256xf32>
    %3 = vector.broadcast %1 : vector<8x1xf32> to vector<8x256xf32>
    %4 = arith.mulf %3, %2 : vector<8x256xf32>
    %c0_3 = arith.constant 0 : index
    %c0_4 = arith.constant 0 : index
    %5 = vector.load %arg4[%c0_3, %c0_4] : memref<8x256xf32, #tpu.memory_space<vmem>>, vector<8x256xf32>
    tpu.vector_store %arg4[%c0_3, %c0_4], %4 {strides = array<i32>} : memref<8x256xf32, #tpu.memory_space<vmem>>, vector<8x256xf32>,
    return
  }
  func.func @transform_0(%arg0: i32, %arg1: i32) -> (i32, i32) {
    %c0_i32 = arith.constant 0 : i32
    %c0_i32_0 = arith.constant 0 : i32
    return %arg0, %c0_i32 : i32, i32
  }
  func.func @transform_1(%arg0: i32, %arg1: i32) -> (i32, i32) {
    %c0_i32 = arith.constant 0 : i32
    return %arg0, %arg1 : i32, i32
  }
  func.func @transform_2(%arg0: i32, %arg1: i32) -> (i32, i32) {
    %c0_i32 = arith.constant 0 : i32
    return %arg0, %arg1 : i32, i32
  }
}

</mosaic_0001>

<bundles_post_ra>
// kernel: tpu_custom_call.1
= control target key start
LH: loop header
LB: loop body
LE: loop exit
PB: predicated region body
PF: predicated region fallthrough
CT: control target
= control target key end

     0   :  { %7 = vsyncpa [#allocation3], 0  ;;  %s132_s0 = inlined_call_operand.vmem [shape: f32[8,1], index: 0, kind: input, shape index: {}]   ;;  %s133_s1 = inlined_call_operand.hbm [shape: f32[8,256], index: 1, kind: input, shape index: {}]   ;;  %s134_s2 = inlined_call_operand.hbm [shape: f32[8,256], index: 2, kind: output, shape index: {}]  }
   0x1   :  { %8 = vsyncpa [#allocation4], 0  ;;  %s105_s9 = smov [#allocation2]  }
   0x2   :  { %s17_s10 = sshll.u32 %s105_s9, 4  ;;  %s18_s10 = int_to_ptr.vmem [resolvable:$true] %s17_s10 }
   0x3   :  { %s69_s11 = scalar_lea.vmem %s18_s10, 256  ;;  %p74_p1 = scmp.lt.s32.totalorder %s18_s10, %s18_s10 }
   0x4   :  { %p70_p0 = scmp.ne.s32.totalorder %s18_s10, %s69_s11  ;;  %p75_p2 = scmp.lt.s32.totalorder %s69_s11, %s69_s11 }
   0x6   :  { %p76_p3 = por %p75_p2, %p74_p1 }
   0x8   :  { %p77_p4 = pnand %p76_p3, %p70_p0 }
   0xa   :  { %80 = shalt.err (!%p77_p4)
}
   0xb   :  { %20 = dma.hbm_to_vmem [thread:$0]  %s133_s1, 256, %s18_s10, [#allocation3]  }
   0xc   :  { %101 = dma.done.wait [#allocation3], 256  }
   0xd   :  { %102 = vsyncadd [#allocation3], 4294967040  ;;  %v106_v0 = vmov 0   ;;  %v26_v1 = vld [vmem:[%s132_s0] sm:$0xff]  ;;  %v25_v3 = vld [vmem:[#allocation2 + $0x8] sm:$0xff]  ;;  %s107_s16 = smov [#allocation5]  }
   0xe   :  { %56 = vset.pattern.permute.xlu0 %v106_v0  ;;  %v24_v2 = vld [vmem:[#allocation2] sm:$0xff]  ;;  %s44_s17 = sshll.u32 %s107_s16, 4  ;;  %s45_s17 = int_to_ptr.vmem [resolvable:$true] %s44_s17 }
   0xf   :  { %31 = vperm.xlu0 %56, %v26_v1   ;;  %57 = vtanh.f32 %v24_v2  ;;  %s81_s1 = scalar_lea.vmem %s45_s17, 256  ;;  %p86_p6 = scmp.lt.s32.totalorder %s45_s17, %s45_s17 }
  0x10   :  { %59 = vtanh.f32 %v25_v3  ;;  %p82_p5 = scmp.ne.s32.totalorder %s45_s17, %s81_s1  ;;  %p87_p7 = scmp.lt.s32.totalorder %s81_s1, %s81_s1 }
  0x12   :  { %p88_p8 = por %p87_p7, %p86_p6 }
  0x14   :  { %p89_p9 = pnand %p88_p8, %p82_p5 }
  0x1c   :  { %v58_v4 = vpop.eup %57 }
  0x1d   :  { %v60_v5 = vpop.eup %59 }
  0x8a   :  { %v32_v6 = vpop.permute.xlu0 %31 }
  0x8b   :  { %v34_v7 = vmul.f32 %v58_v4, %v32_v6  ;;  %v35_v8 = vmul.f32 %v60_v5, %v32_v6 }
  0x8d   :  { %36 = vst [vmem:[#allocation5] sm:$0xff] %v34_v7  ;;  %37 = vst [vmem:[#allocation5 + $0x8] sm:$0xff] %v35_v8 }
  0x8e   :  { %92 = shalt.err (!%p89_p9)
}
  0x8f   :  { %47 = dma.vmem_to_hbm [thread:$0]  %s45_s17, 256, %s134_s2, [#allocation4]  }
  0x90   :  { %103 = dma.done.wait [#allocation4], 256  }
  0x91   :  { %104 = vsyncadd [#allocation4], 4294967040 }
  0x92   :  { %51 = vsyncpa [#allocation3], 1 }
  0x93   :  { %52 = vsyncpa [#allocation4], 1 }

</bundles_post_ra>
